<compile_context>
chip_gen: v6e
topology: v6e:2x2x1
jax: 0.10.0
libtpu: 0.0.40
codegen_flags: <defaults>
</compile_context>

<pallas_src>
import math

import jax
import jax.numpy as jnp
from jax import lax
from jax.experimental import pallas as pl
from jax.experimental.pallas import tpu as pltpu

_NEG_INF = -1e30


def _round_up(x: int, m: int) -> int:
    return ((x + m - 1) // m) * m


# ---------------------------------------------------------------------------
# Single-tile path: whole (restricted-softmax) attention for G graphs per step.
# ---------------------------------------------------------------------------
def _make_single_tile_kernel(scale: float, compute_dtype):
    def kernel(q_ref, k_ref, v_ref, o_ref):
        # Scale in f32, then cast operands for the MXU; accumulate in f32.
        q = (q_ref[...].astype(jnp.float32) * scale).astype(compute_dtype)
        k = k_ref[...].astype(compute_dtype)
        v = v_ref[...].astype(compute_dtype)

        s = jnp.einsum("gqd,gkd->gqk", q, k,
                       preferred_element_type=jnp.float32)
        smax = jnp.maximum(jnp.max(s, axis=-1, keepdims=True), 0.0)
        p = jnp.exp(s - smax)
        denom = jnp.sum(p, axis=-1, keepdims=True) + jnp.exp(-smax)
        inv = pl.reciprocal(denom, approx=True)
        out = jnp.einsum("gqk,gkd->gqd", (p * inv).astype(compute_dtype), v,
                         preferred_element_type=jnp.float32)
        o_ref[...] = out.astype(o_ref.dtype)

    return kernel


def _attention_single_tile(query, key, value, scale, compute_dtype):
    B, Lq, D = query.shape
    Lk = key.shape[1]
    Dv = value.shape[-1]
    itemsize = jnp.dtype(query.dtype).itemsize

    # Pack G graphs per grid step (amortize per-step overhead, fill vregs);
    # keep the per-step working set around ~4 MiB.
    per_graph_bytes = 4 * (Lq * D + Lk * D + Lk * Dv + Lq * Dv + 3 * Lq * Lk)
    g_cap = max(1, (4 * 1024 * 1024) // max(per_graph_bytes, 1))
    G = max(1, min(B, g_cap, 4096))

    Bp = _round_up(B, G)
    if Bp != B:
        # Zero-padded graphs are harmless (scores 0 -> p = 1/(Lk+1), out = 0)
        # and sliced off below.
        pad = ((0, Bp - B), (0, 0), (0, 0))
        query = jnp.pad(query, pad)
        key = jnp.pad(key, pad)
        value = jnp.pad(value, pad)

    n_steps = Bp // G
    kernel = _make_single_tile_kernel(scale, compute_dtype)

    block_bytes = G * per_graph_bytes
    vmem_limit = int(min(100 * 1024 * 1024, max(8 * 1024 * 1024, 4 * block_bytes)))

    cost = pl.CostEstimate(
        flops=2 * B * Lq * Lk * (D + Dv),
        transcendentals=B * Lq * (Lk + 1),
        bytes_accessed=(query.size + key.size + value.size + B * Lq * Dv) * itemsize,
    )

    out = pl.pallas_call(
        kernel,
        out_shape=jax.ShapeDtypeStruct((Bp, Lq, Dv), query.dtype),
        grid_spec=pltpu.PrefetchScalarGridSpec(
            num_scalar_prefetch=0,
            grid=(n_steps,),
            in_specs=[
                pl.BlockSpec((G, Lq, D), lambda i: (i, 0, 0)),
                pl.BlockSpec((G, Lk, D), lambda i: (i, 0, 0)),
                pl.BlockSpec((G, Lk, Dv), lambda i: (i, 0, 0)),
            ],
            out_specs=pl.BlockSpec((G, Lq, Dv), lambda i: (i, 0, 0)),
        ),
        compiler_params=pltpu.CompilerParams(
            dimension_semantics=("parallel",),
            vmem_limit_bytes=vmem_limit,
        ),
        cost_estimate=cost,
    )(query, key, value)

    return out[:B]


# ---------------------------------------------------------------------------
# Flash path: online restricted softmax over KV tiles (long sequences).
# ---------------------------------------------------------------------------
def _make_flash_kernel(scale: float, lk_valid: int, tk: int, mask_every: bool,
                       compute_dtype):
    def kernel(q_ref, k_ref, v_ref, o_ref, qs_sc, m_sc, l_sc, acc_sc):
        ki = pl.program_id(2)

        @pl.when(ki == 0)
        def _init():
            # Scale + cast Q once per Q tile (resident across the KV axis).
            qs_sc[...] = (q_ref[...].astype(jnp.float32) * scale).astype(qs_sc.dtype)
            # Restricted softmax clamps the row max at 0, so the running max
            # starts at 0; the +exp(0 - m) term is added once at finalization.
            m_sc[...] = jnp.zeros_like(m_sc)
            l_sc[...] = jnp.zeros_like(l_sc)
            acc_sc[...] = jnp.zeros_like(acc_sc)

        q = qs_sc[...]
        k = k_ref[...].astype(compute_dtype)
        v = v_ref[...]

        # scores (TQ, TK) = (Q * scale) @ K^T, f32 accumulation on the MXU.
        s = lax.dot_general(q, k, (((1,), (1,)), ((), ())),
                            preferred_element_type=jnp.float32)

        if mask_every:
            # Only emitted when Lk had to be padded to a tile multiple.
            col = ki * tk + lax.broadcasted_iota(jnp.int32, s.shape, 1)
            s = jnp.where(col < lk_valid, s, _NEG_INF)

        m_prev = m_sc[...]
        m_new = jnp.maximum(m_prev, jnp.max(s, axis=-1, keepdims=True))
        alpha = jnp.exp(m_prev - m_new)
        p = jnp.exp(s - m_new)

        l_sc[...] = alpha * l_sc[...] + jnp.sum(p, axis=-1, keepdims=True)
        acc_sc[...] = alpha * acc_sc[...] + lax.dot_general(
            p.astype(compute_dtype), v.astype(compute_dtype),
            (((1,), (0,)), ((), ())),
            preferred_element_type=jnp.float32)
        m_sc[...] = m_new

        @pl.when(ki == pl.num_programs(2) - 1)
        def _finalize():
            # restricted softmax denom = sum(exp(s - m)) + exp(0 - m)
            m = m_sc[...]
            denom = l_sc[...] + jnp.exp(-m)
            inv = pl.reciprocal(denom, approx=True)
            o_ref[...] = (acc_sc[...] * inv).astype(o_ref.dtype)

    return kernel


def _attention_flash(query, key, value, scale, compute_dtype, tq_max, tk_max):
    B, Lq, D = query.shape
    Lk = key.shape[1]
    Dv = value.shape[-1]
    itemsize = jnp.dtype(query.dtype).itemsize

    # ---- Q tile: prefer a divisor of Lq (no pad); zero-pad only as a fallback.
    if Lq <= tq_max:
        tq, lq_p = Lq, Lq
    else:
        tq = next((t for t in (tq_max, 256, 128) if t <= tq_max and Lq % t == 0), None)
        if tq is None:
            tq = 128
            lq_p = _round_up(Lq, tq)   # padded Q rows are harmless, sliced off
        else:
            lq_p = Lq

    # ---- K/V tile: prefer a divisor of Lk (no pad, no mask); else pad + mask.
    if Lk <= tk_max:
        tk, lk_p, mask_every = Lk, Lk, False
    else:
        tk = next((t for t in (tk_max, 512, 256, 128) if t <= tk_max and Lk % t == 0), None)
        if tk is None:
            tk = min(tk_max, 512)
            lk_p = _round_up(Lk, tk)
            mask_every = True
        else:
            lk_p, mask_every = Lk, False

    qp = query if lq_p == Lq else jnp.pad(query, ((0, 0), (0, lq_p - Lq), (0, 0)))
    kp = key if lk_p == Lk else jnp.pad(key, ((0, 0), (0, lk_p - Lk), (0, 0)))
    vp = value if lk_p == Lk else jnp.pad(value, ((0, 0), (0, lk_p - Lk), (0, 0)))

    n_q = lq_p // tq
    n_k = lk_p // tk

    kernel = _make_flash_kernel(scale, Lk, tk, mask_every, compute_dtype)

    cdt_size = jnp.dtype(compute_dtype).itemsize
    block_bytes = (2 * (tq * D + tk * D + tk * Dv + tq * Dv) * itemsize  # dbl-buffered I/O
                   + tq * D * cdt_size                                   # scaled-Q scratch
                   + (tq * Dv + 2 * tq) * 4                              # acc + m + l
                   + 3 * tq * tk * 4)                                    # s/p temporaries
    vmem_limit = int(min(100 * 1024 * 1024, max(8 * 1024 * 1024, 2 * block_bytes)))

    cost = pl.CostEstimate(
        flops=2 * B * lq_p * lk_p * (D + Dv),
        transcendentals=B * (lq_p * lk_p + lq_p * n_k + lq_p),
        # K/V are re-streamed once per Q tile.
        bytes_accessed=(B * lq_p * D + n_q * B * lk_p * (D + Dv) + B * lq_p * Dv) * itemsize,
    )

    out = pl.pallas_call(
        kernel,
        out_shape=jax.ShapeDtypeStruct((B, lq_p, Dv), query.dtype),
        grid_spec=pltpu.PrefetchScalarGridSpec(
            num_scalar_prefetch=0,
            grid=(B, n_q, n_k),
            in_specs=[
                # Q tile resident across the KV axis.
                pl.BlockSpec((None, tq, D), lambda b, qi, ki: (b, qi, 0)),
                pl.BlockSpec((None, tk, D), lambda b, qi, ki: (b, ki, 0)),
                pl.BlockSpec((None, tk, Dv), lambda b, qi, ki: (b, ki, 0)),
            ],
            out_specs=pl.BlockSpec((None, tq, Dv), lambda b, qi, ki: (b, qi, 0)),
            scratch_shapes=[
                pltpu.VMEM((tq, D), compute_dtype),   # scaled + cast Q (hoisted)
                pltpu.VMEM((tq, 1), jnp.float32),     # running max m
                pltpu.VMEM((tq, 1), jnp.float32),     # running denom l
                pltpu.VMEM((tq, Dv), jnp.float32),    # f32 accumulator
            ],
        ),
        compiler_params=pltpu.CompilerParams(
            dimension_semantics=("parallel", "parallel", "arbitrary"),
            vmem_limit_bytes=vmem_limit,
        ),
        cost_estimate=cost,
    )(qp, kp, vp)

    return out[:, :Lq, :]


# ---------------------------------------------------------------------------
# Public entry point.
# ---------------------------------------------------------------------------
def attention_pallas(query: jax.Array, key: jax.Array, value: jax.Array,
                     *, compute_dtype=jnp.bfloat16,
                     tq_max: int = 256, tk_max: int = 512) -> jax.Array:
    """Pallas equivalent of Attention.forward(query, key, value).

    query: [B, Lq, D], key: [B, Lk, D], value: [B, Lk, Dv] -> [B, Lq, Dv]
    """
    assert query.ndim == key.ndim == value.ndim == 3
    assert query.shape[-1] == key.shape[-1]
    assert key.shape[-2] == value.shape[-2]
    assert query.shape[0] == key.shape[0] == value.shape[0]

    # TODO(synk): F.dropout with p > 0 is not implemented (module default p=0 -> identity).

    B, Lq, D = query.shape
    Lk = key.shape[1]
    scale = 1.0 / math.sqrt(D)

    # Don't up-cast already-narrow inputs; f32 inputs use bf16 MXU operands
    # with f32 accumulation.
    if jnp.dtype(query.dtype).itemsize <= jnp.dtype(compute_dtype).itemsize:
        compute_dtype = query.dtype

    # Tiny-attention regime (the shapes this module is used with in GATv2):
    # do the whole softmax per graph and pack many graphs per grid step.
    if Lq <= 128 and Lk <= 1024:
        return _attention_single_tile(query, key, value, scale, compute_dtype)

    return _attention_flash(query, key, value, scale, compute_dtype, tq_max, tk_max)


def attention_reference(query, key, value):
    """Pure-JAX reference mirroring the PyTorch module."""
    score = jnp.einsum("...qd,...kd->...qk", query, key)
    score = score / math.sqrt(key.shape[-1])
    smax = jnp.maximum(jnp.max(score, axis=-1, keepdims=True), 0.0)
    e = jnp.exp(score - smax)
    p = e / (jnp.sum(e, axis=-1, keepdims=True) + jnp.exp(0.0 - smax))
    return jnp.einsum("...qk,...kd->...qd", p, value)


if __name__ == "__main__":
    key0 = jax.random.PRNGKey(0)
    kq, kk, kv = jax.random.split(key0, 3)

    # Primary, module-realistic shapes: batch=2, seq=8, hidden=32 (single-tile path).
    B, Lq, Lk, D, Dv = 2, 8, 8, 32, 32
    q = jax.random.normal(kq, (B, Lq, D), dtype=jnp.float32)
    k = jax.random.normal(kk, (B, Lk, D), dtype=jnp.float32)
    v = jax.random.normal(kv, (B, Lk, Dv), dtype=jnp.float32)

    out = jax.block_until_ready(attention_pallas(q, k, v))
    ref = attention_reference(q, k, v)
    assert out.shape == (B, Lq, Dv)
    # bf16 MXU operands + approx reciprocal -> slightly looser tolerance.
    assert jnp.allclose(out, ref, atol=2e-2, rtol=2e-2), "single-tile path mismatch"

    # Also exercise the flash-tiled path once (longer sequences, multiple KV steps).
    B2, Lq2, Lk2 = 2, 512, 1024
    q2 = jax.random.normal(kq, (B2, Lq2, D), dtype=jnp.float32)
    k2 = jax.random.normal(kk, (B2, Lk2, D), dtype=jnp.float32)
    v2 = jax.random.normal(kv, (B2, Lk2, Dv), dtype=jnp.float32)
    out2 = jax.block_until_ready(attention_pallas(q2, k2, v2))
    ref2 = attention_reference(q2, k2, v2)
    assert out2.shape == (B2, Lq2, Dv)
    assert jnp.allclose(out2, ref2, atol=2e-2, rtol=2e-2), "flash path mismatch"

    print("KERNEL_OK")
</pallas_src>

<mosaic_0001>
module attributes {stable_mosaic.version = 11 : i64} {
  func.func @kernel(%arg0: i32, %arg1: memref<2x8x32xf32, #tpu.memory_space<vmem>>, %arg2: memref<2x8x32xf32, #tpu.memory_space<vmem>>, %arg3: memref<2x8x32xf32, #tpu.memory_space<vmem>>, %arg4: memref<2x8x32xf32, #tpu.memory_space<vmem>>) attributes {dimension_semantics = [#tpu.dimension_semantics<parallel>], iteration_bounds = array<i64: 1>, scalar_prefetch = 0 : i64, scratch_operands = 0 : i64, tpu.core_type = #tpu.core_type<tc>, window_params = [{transform_indices = @transform_0, window_bounds = array<i64: 2, 8, 32>}, {transform_indices = @transform_1, window_bounds = array<i64: 2, 8, 32>}, {transform_indices = @transform_2, window_bounds = array<i64: 2, 8, 32>}, {transform_indices = @transform_3, window_bounds = array<i64: 2, 8, 32>}]} {
    %c0 = arith.constant 0 : index
    %c0_0 = arith.constant 0 : index
    %c0_1 = arith.constant 0 : index
    %0 = vector.load %arg1[%c0, %c0_0, %c0_1] : memref<2x8x32xf32, #tpu.memory_space<vmem>>, vector<2x8x32xf32>
    %cst = arith.constant 0.176776692 : f32
    %1 = vector.broadcast %cst : f32 to vector<2x8x32xf32>
    %2 = arith.mulf %0, %1 : vector<2x8x32xf32>
    %3 = arith.truncf %2 : vector<2x8x32xf32> to vector<2x8x32xbf16>
    %c0_2 = arith.constant 0 : index
    %c0_3 = arith.constant 0 : index
    %c0_4 = arith.constant 0 : index
    %4 = vector.load %arg2[%c0_2, %c0_3, %c0_4] : memref<2x8x32xf32, #tpu.memory_space<vmem>>, vector<2x8x32xf32>
    %5 = arith.truncf %4 : vector<2x8x32xf32> to vector<2x8x32xbf16>
    %c0_5 = arith.constant 0 : index
    %c0_6 = arith.constant 0 : index
    %c0_7 = arith.constant 0 : index
    %6 = vector.load %arg3[%c0_5, %c0_6, %c0_7] : memref<2x8x32xf32, #tpu.memory_space<vmem>>, vector<2x8x32xf32>
    %7 = arith.truncf %6 : vector<2x8x32xf32> to vector<2x8x32xbf16>
    "tpu.trace_start"() <{level = 10 : i32, message = "gqd,gkd->gqk"}> : () -> ()
    %cst_8 = arith.constant dense<0.000000e+00> : vector<2x8x8xf32>
    %8 = tpu.matmul %3, %5, %cst_8 {dimension_numbers = #tpu.dot_dimension_numbers<[2], [2], [1], [1], [0, 0, 0, 1, 1, 1], [0], [0]>} : vector<2x8x32xbf16>, vector<2x8x32xbf16>, vector<2x8x8xf32> -> vector<2x8x8xf32>
    "tpu.trace_stop"() : () -> ()
    %cst_9 = arith.constant dense<0xFF800000> : vector<2x8xf32>
    %9 = vector.multi_reduction <maximumf>, %8, %cst_9 [2] : vector<2x8x8xf32> to vector<2x8xf32>
    %10 = vector.shape_cast %9 : vector<2x8xf32> to vector<2x8x1xf32>
    %cst_10 = arith.constant 0.000000e+00 : f32
    %11 = vector.broadcast %cst_10 : f32 to vector<2x8x1xf32>
    %12 = arith.maximumf %10, %11 : vector<2x8x1xf32>
    %13 = vector.broadcast %12 : vector<2x8x1xf32> to vector<2x8x8xf32>
    %14 = arith.subf %8, %13 : vector<2x8x8xf32>
    %15 = math.exp %14 : vector<2x8x8xf32>
    %cst_11 = arith.constant dense<0.000000e+00> : vector<2x8xf32>
    %16 = vector.multi_reduction <add>, %15, %cst_11 [2] : vector<2x8x8xf32> to vector<2x8xf32>
    %17 = vector.shape_cast %16 : vector<2x8xf32> to vector<2x8x1xf32>
    %cst_12 = arith.constant 0.000000e+00 : f32
    %18 = vector.broadcast %cst_12 : f32 to vector<2x8x1xf32>
    %19 = arith.subf %18, %12 : vector<2x8x1xf32>
    %20 = math.exp %19 : vector<2x8x1xf32>
    %21 = arith.addf %17, %20 : vector<2x8x1xf32>
    %22 = tpu.reciprocal %21 {approx = true} : vector<2x8x1xf32> -> vector<2x8x1xf32>
    %23 = vector.broadcast %22 : vector<2x8x1xf32> to vector<2x8x8xf32>
    %24 = arith.mulf %15, %23 : vector<2x8x8xf32>
    %25 = arith.truncf %24 : vector<2x8x8xf32> to vector<2x8x8xbf16>
    "tpu.trace_start"() <{level = 10 : i32, message = "gqk,gkd->gqd"}> : () -> ()
    %cst_13 = arith.constant dense<0.000000e+00> : vector<2x8x32xf32>
    %26 = tpu.matmul %25, %7, %cst_13 {dimension_numbers = #tpu.dot_dimension_numbers<[2], [1], [1], [2], [0, 0, 0, 1, 1, 2], [0], [0]>} : vector<2x8x8xbf16>, vector<2x8x32xbf16>, vector<2x8x32xf32> -> vector<2x8x32xf32>
    "tpu.trace_stop"() : () -> ()
    %c0_14 = arith.constant 0 : index
    %c0_15 = arith.constant 0 : index
    %c0_16 = arith.constant 0 : index
    %27 = vector.load %arg4[%c0_14, %c0_15, %c0_16] : memref<2x8x32xf32, #tpu.memory_space<vmem>>, vector<2x8x32xf32>
    tpu.vector_store %arg4[%c0_14, %c0_15, %c0_16], %26 {strides = array<i32>} : memref<2x8x32xf32, #tpu.memory_space<vmem>>, vector<2x8x32xf32>,
    return
  }
  func.func @transform_0(%arg0: i32) -> (i32, i32, i32) {
    %c0_i32 = arith.constant 0 : i32
    %c0_i32_0 = arith.constant 0 : i32
    %c0_i32_1 = arith.constant 0 : i32
    return %arg0, %c0_i32, %c0_i32_0 : i32, i32, i32
  }
  func.func @transform_1(%arg0: i32) -> (i32, i32, i32) {
    %c0_i32 = arith.constant 0 : i32
    %c0_i32_0 = arith.constant 0 : i32
    %c0_i32_1 = arith.constant 0 : i32
    return %arg0, %c0_i32, %c0_i32_0 : i32, i32, i32
  }
  func.func @transform_2(%arg0: i32) -> (i32, i32, i32) {
    %c0_i32 = arith.constant 0 : i32
    %c0_i32_0 = arith.constant 0 : i32
    %c0_i32_1 = arith.constant 0 : i32
    return %arg0, %c0_i32, %c0_i32_0 : i32, i32, i32
  }
  func.func @transform_3(%arg0: i32) -> (i32, i32, i32) {
    %c0_i32 = arith.constant 0 : i32
    %c0_i32_0 = arith.constant 0 : i32
    %c0_i32_1 = arith.constant 0 : i32
    return %arg0, %c0_i32, %c0_i32_0 : i32, i32, i32
  }
}

</mosaic_0001>

<bundles_post_ra>
// kernel: tpu_custom_call.1
= control target key start
LH: loop header
LB: loop body
LE: loop exit
PB: predicated region body
PF: predicated region fallthrough
CT: control target
= control target key end

     0   :  { %8 = vsyncpa [#allocation3], 0  ;;  %s522_s0 = inlined_call_operand.hbm [shape: f32[2,8,32], index: 0, kind: input, shape index: {}]   ;;  %s523_s1 = inlined_call_operand.hbm [shape: f32[2,8,32], index: 1, kind: input, shape index: {}]   ;;  %s524_s2 = inlined_call_operand.hbm [shape: f32[2,8,32], index: 2, kind: input, shape index: {}]   ;;  %s525_s3 = inlined_call_operand.hbm [shape: f32[2,8,32], index: 3, kind: output, shape index: {}]  }
   0x1   :  { %9 = vsyncpa [#allocation6], 0 }
   0x2   :  { %10 = vsyncpa [#allocation4], 0  ;;  %s454_s12 = smov [#allocation5]   ;;  %s455_s14 = smov [#allocation2]  }
   0x3   :  { %s28_s13 = sshll.u32 %s454_s12, 4  ;;  %s16_s15 = sshll.u32 %s455_s14, 4  ;;  %s29_s13 = int_to_ptr.vmem [resolvable:$true] %s28_s13  ;;  %s17_s15 = int_to_ptr.vmem [resolvable:$true] %s16_s15 }
   0x4   :  { %s376_s16 = scalar_lea.vmem %s29_s13, 256  ;;  %p381_p1 = scmp.lt.s32.totalorder %s29_s13, %s29_s13 }
   0x5   :  { %p377_p0 = scmp.ne.s32.totalorder %s29_s13, %s376_s16  ;;  %p382_p2 = scmp.lt.s32.totalorder %s376_s16, %s376_s16 }
   0x7   :  { %p383_p3 = por %p382_p2, %p381_p1 }
   0x9   :  { %p384_p4 = pnand %p383_p3, %p377_p0 }
   0xb   :  { %387 = shalt.err (!%p384_p4)
}
   0xc   :  { %s456_s17 = smov 128   ;;  %s457_s18 = smov 8  }
   0xd   :  { %34 = dma.hbm_to_vmem [thread:$0]  %s523_s1, 256, %s29_s13, [#allocation6], %s456_s17, %s456_s17, %s457_s18  }
   0xe   :  { %s396_s21 = scalar_lea.vmem %s17_s15, 256  ;;  %p401_p6 = scmp.lt.s32.totalorder %s17_s15, %s17_s15 }
   0xf   :  { %p397_p5 = scmp.ne.s32.totalorder %s17_s15, %s396_s21  ;;  %p402_p7 = scmp.lt.s32.totalorder %s396_s21, %s396_s21 }
  0x11   :  { %p403_p8 = por %p402_p7, %p401_p6 }
  0x13   :  { %p404_p9 = pnand %p403_p8, %p397_p5 }
  0x15   :  { %407 = shalt.err (!%p404_p9)
}
  0x16   :  { %22 = dma.hbm_to_vmem [thread:$0]  %s522_s0, 256, %s17_s15, [#allocation3], %s456_s17, %s456_s17, %s457_s18  }
  0x17   :  { %s458_s24 = smov [#allocation7]  }
  0x18   :  { %s40_s25 = sshll.u32 %s458_s24, 4  ;;  %s41_s25 = int_to_ptr.vmem [resolvable:$true] %s40_s25 }
  0x19   :  { %s416_s26 = scalar_lea.vmem %s41_s25, 256  ;;  %p421_p11 = scmp.lt.s32.totalorder %s41_s25, %s41_s25 }
  0x1a   :  { %p417_p10 = scmp.ne.s32.totalorder %s41_s25, %s416_s26  ;;  %p422_p12 = scmp.lt.s32.totalorder %s416_s26, %s416_s26 }
  0x1c   :  { %p423_p13 = por %p422_p12, %p421_p11 }
  0x1e   :  { %p424_p0 = pnand %p423_p13, %p417_p10 }
  0x20   :  { %427 = shalt.err (!%p424_p0)
}
  0x21   :  { %46 = dma.hbm_to_vmem [thread:$0]  %s524_s2, 256, %s41_s25, [#allocation6], %s456_s17, %s456_s17, %s457_s18  }
  0x22   :  { %448 = dma.done.wait [#allocation3], 256  }
  0x23   :  { %449 = vsyncadd [#allocation3], 4294967040 }
  0x24   :  { %450 = dma.done.wait [#allocation6], 512  }
  0x25   :  { %451 = vsyncadd [#allocation6], 4294966784  ;;  %v459_v0 = vmov 0.0   ;;  %vm460_vm0 = vmmov 0   ;;  %v63_v1 = vld [vmem:[#allocation5] sm:$0xff]  ;;  %vm71_vm1 = vcmask 261120  }
  0x26   :  { %324 = vmatprep.subr.bf16.mxu0 %v459_v0  ;;  %330 = vmatprep.subr.bf16.mxu1 %v459_v0  ;;  %v64_v2 = vld [vmem:[#allocation5 + $0x8] sm:$0xff]  ;;  %v57_v3 = vld [vmem:[#allocation2] sm:$0xff]  ;;  %v65_v4 = vpack.c.bf16 %v63_v1, %v63_v1  ;;  %v58_v6 = vld [vmem:[#allocation2 + $0x8] sm:$0xff]  ;;  %vm164_vm2 = vcmask 64512   ;;  %vm202_vm3 = vcmask 1043456   ;;  %s461_s0 = smov [#allocation8]  }
  0x27   :  { %326 = vmatprep.mubr.msk.bf16.mxu0 %vm460_vm0, %v459_v0  ;;  %332 = vmatprep.mubr.msk.bf16.mxu1 %vm460_vm0, %v459_v0  ;;  %v66_v5 = vpack.c.bf16 %v64_v2, %v64_v2  ;;  %v59_v9 = vmul.f32 0.17677669, %v57_v3  ;;  %v60_v10 = vmul.f32 0.17677669, %v58_v6  ;;  %v67_v35 = vld [vmem:[#allocation7] sm:$0xff]  ;;  %v68_v36 = vld [vmem:[#allocation7 + $0x8] sm:$0xff] }
  0x28   :  { %v76_v7 = vsel %vm71_vm1, %v65_v4, 0  ;;  %v69_v37 = vpack.c.bf16 %v67_v35, %v67_v35  ;;  %v70_v38 = vpack.c.bf16 %v68_v36, %v68_v36  ;;  %s299_s2 = sshll.u32 %s461_s0, 4  ;;  %s300_s2 = int_to_ptr.vmem [resolvable:$true] %s299_s2 }
  0x29   :  { %v122_v8 = vsel %vm71_vm1, %v66_v5, 0  ;;  %325 = vmatpush3.bf16.xpose.msra.mxu0 %v76_v7  ;;  %v61_v11 = vpack.c.bf16 %v59_v9, %v59_v9  ;;  %v62_v12 = vpack.c.bf16 %v60_v10, %v60_v10  ;;  %s428_s28 = scalar_lea.vmem %s300_s2, 256  ;;  %p433_p2 = scmp.lt.s32.totalorder %s300_s2, %s300_s2 }
  0x2a   :  { %331 = vmatpush3.bf16.xpose.msra.mxu1 %v122_v8  ;;  %336 = vmatprep.subr.bf16.mxu0 %v459_v0  ;;  %v204_v39 = vsel %vm202_vm3, %v69_v37, 0  ;;  %v250_v40 = vsel %vm202_vm3, %v70_v38, 0  ;;  %p429_p1 = scmp.ne.s32.totalorder %s300_s2, %s428_s28  ;;  %p434_p3 = scmp.lt.s32.totalorder %s428_s28, %s428_s28 }
  0x2b   :  { %342 = vmatprep.subr.bf16.mxu1 %v459_v0 }
  0x2c   :  { %p435_p4 = por %p434_p3, %p433_p2 }
  0x2e   :  { %p436_p5 = pnand %p435_p4, %p429_p1 }
  0x30   :  { %327 = vmatmul.mubr.msk.bf16.vlgmr.msra.gmra.mxu0 %vm71_vm1, %v61_v11 }
  0x31   :  { %333 = vmatmul.mubr.msk.bf16.vlgmr.msra.gmra.mxu1 %vm71_vm1, %v62_v12  ;;  %338 = vmatprep.mubr.msk.bf16.mxu0 %vm460_vm0, %v459_v0 }
  0x32   :  { %344 = vmatprep.mubr.msk.bf16.mxu1 %vm460_vm0, %v459_v0  ;;  %337 = vmatpush3.bf16.msra.mxu0 %v204_v39 }
  0x33   :  { %343 = vmatpush3.bf16.msra.mxu1 %v250_v40 }
  0xf0   :  { %v112_v13 = vpop.f32.mrf.mxu0 }
  0xf1   :  { %v158_v14 = vpop.f32.mrf.mxu1  ;;  %v165_v15 = vsel %vm164_vm2, %v112_v13, -inf }
  0xf2   :  { %166 = vmax.xlane.f32.xlu0 %v165_v15  ;;  %v328_v17 = vpop.f32.mrf.mxu0  ;;  %v168_v18 = vsel %vm164_vm2, %v158_v14, -inf }
  0xf3   :  { %v334_v16 = vpop.f32.mrf.mxu1 }
  0xf4   :  { %v115_v19 = vpop.f32.mrf.mxu0 }
  0xf5   :  { %v161_v20 = vpop.f32.mrf.mxu1 }
  0xf6   :  { %169 = vmax.xlane.f32.xlu0 %v168_v18  ;;  %v329_v22 = vpop.f32.mrf.mxu0 }
  0xf7   :  { %v335_v21 = vpop.f32.mrf.mxu1 }
 0x17b   :  { %v167_v23 = vpop.xlane.xlu0 %166 }
 0x17c   :  { %v171_v24 = vmax.f32 %v167_v23, 0.0 }
 0x17e   :  { %v173_v25 = vsub.f32 %v112_v13, %v171_v24  ;;  %v185_v41 = vsub.f32 0.0, %v171_v24 }
 0x17f   :  { %v170_v26 = vpop.xlane.xlu0 %169 }
 0x180   :  { %v175_v27 = vmul.f32 1.442695, %v173_v25  ;;  %v172_v28 = vmax.f32 %v170_v26, 0.0  ;;  %v187_v42 = vmul.f32 1.442695, %v185_v41 }
 0x182   :  { %356 = vpow2.f32 %v175_v27  ;;  %v174_v29 = vsub.f32 %v158_v14, %v172_v28  ;;  %v186_v43 = vsub.f32 0.0, %v172_v28 }
 0x184   :  { %v177_v30 = vmul.f32 1.442695, %v174_v29  ;;  %v189_v44 = vmul.f32 1.442695, %v186_v43 }
 0x186   :  { %358 = vpow2.f32 %v177_v30 }
 0x187   :  { %360 = vpow2.f32 %v187_v42 }
 0x188   :  { %362 = vpow2.f32 %v189_v44 }
 0x18f   :  { %v357_v31 = vpop.eup %356 }
 0x190   :  { %v179_v32 = vsel %vm164_vm2, %v357_v31, 0.0 }
 0x191   :  { %180 = vadd.xlane.f32.xlu1 %v179_v32 }
 0x193   :  { %v359_v33 = vpop.eup %358 }
 0x194   :  { %v182_v34 = vsel %vm164_vm2, %v359_v33, 0.0  ;;  %v361_v45 = vpop.eup %360 }
 0x195   :  { %183 = vadd.xlane.f32.xlu1 %v182_v34  ;;  %v363_v48 = vpop.eup %362 }
 0x21a   :  { %v181_v46 = vpop.xlane.xlu1 %180 }
 0x21b   :  { %v191_v47 = vadd.f32 %v361_v45, %v181_v46 }
 0x21d   :  { %364 = vrcp.f32 %v191_v47 }
 0x21e   :  { %v184_v49 = vpop.xlane.xlu1 %183 }
 0x21f   :  { %v192_v50 = vadd.f32 %v363_v48, %v184_v49 }
 0x221   :  { %366 = vrcp.f32 %v192_v50 }
 0x22a   :  { %v365_v51 = vpop.eup %364 }
 0x22b   :  { %v195_v52 = vmul.f32 %v365_v51, %v357_v31 }
 0x22d   :  { %v197_v53 = vpack.c.bf16 %v195_v52, %v195_v52 }
 0x22e   :  { %v367_v54 = vpop.eup %366 }
 0x22f   :  { %339 = vmatmul.mubr.msk.bf16.vlgmr.msra.gmra.mxu0 %vm164_vm2, %v197_v53  ;;  %v196_v55 = vmul.f32 %v367_v54, %v359_v33 }
 0x231   :  { %v198_v56 = vpack.c.bf16 %v196_v55, %v196_v55 }
 0x233   :  { %345 = vmatmul.mubr.msk.bf16.vlgmr.msra.gmra.mxu1 %vm164_vm2, %v198_v56 }
 0x2ef   :  { %v240_v57 = vpop.f32.mrf.mxu0 }
 0x2f0   :  { %292 = vst.msk [vmem:[#allocation8] sm:$0xff] %vm71_vm1, %v240_v57 }
 0x2f1   :  { %v340_v58 = vpop.f32.mrf.mxu0 }
 0x2f3   :  { %v243_v59 = vpop.f32.mrf.mxu0  ;;  %v286_v60 = vpop.f32.mrf.mxu1 }
 0x2f4   :  { %293 = vst.msk [vmem:[#allocation8 + $0x8] sm:$0xff] %vm71_vm1, %v286_v60 }
 0x2f5   :  { %v341_v61 = vpop.f32.mrf.mxu0  ;;  %v346_v62 = vpop.f32.mrf.mxu1 }
 0x2f6   :  { %439 = shalt.err (!%p436_p5)
}
 0x2f7   :  { %305 = dma.vmem_to_hbm [thread:$0]  %s300_s2, 256, %s525_s3, [#allocation4], %s456_s17, %s456_s17, %s457_s18   ;;  %v289_v63 = vpop.f32.mrf.mxu1 }
 0x2f9   :  { %v347_v0 = vpop.f32.mrf.mxu1 }
 0x2fa   :  { %452 = dma.done.wait [#allocation4], 256  }
 0x2fb   :  { %453 = vsyncadd [#allocation4], 4294967040 }
 0x2fc   :  { %309 = vsyncpa [#allocation3], 1 }
 0x2fd   :  { %310 = vsyncpa [#allocation6], 1 }
 0x2fe   :  { %311 = vsyncpa [#allocation4], 1 }

</bundles_post_ra>
